<compile_context>
chip_gen: v7x
topology: tpu7x:2x2x1
jax: 0.10.0
libtpu: 0.0.40
codegen_flags: <defaults>
</compile_context>

<pallas_src>
import jax
import jax.numpy as jnp
from jax.experimental import pallas as pl
from jax.experimental.pallas import tpu as pltpu

IN_FEATURES = 28 * 28      # 784
HIDDEN = 256               # 200 zero-padded to 256 (lane / MXU friendly)
OUT_PAD = 128              # 10 logits zero-padded to a full 128-lane slab
N_CLASSES = 10


def _round_up(n, m):
    return ((n + m - 1) // m) * m


def _mlp_kernel(x_ref, w1_ref, b1_ref, w2_ref, b2_ref, w3_ref, b3_ref, out_ref):
    # fc1 + ReLU  (bf16 MXU matmul, f32 accumulate / epilogue)
    h1 = jnp.dot(x_ref[...], w1_ref[...], preferred_element_type=jnp.float32)
    h1 = jnp.maximum(h1 + b1_ref[...], 0.0)
    # fc2 + ReLU
    h2 = jnp.dot(h1.astype(jnp.bfloat16), w2_ref[...],
                 preferred_element_type=jnp.float32)
    h2 = jnp.maximum(h2 + b2_ref[...], 0.0)
    # fc3 -> (TILE_B, 128) lane-dense logit slab
    z = jnp.dot(h2.astype(jnp.bfloat16), w3_ref[...],
                preferred_element_type=jnp.float32) + b3_ref[...]
    # Mask padded logit lanes to -inf so the softmax reduction ignores them.
    lane = jax.lax.broadcasted_iota(jnp.int32, z.shape, 1)
    z = jnp.where(lane < N_CLASSES, z, -jnp.inf)
    # Numerically stable log_softmax over the last dim.
    m = jnp.max(z, axis=-1, keepdims=True)
    zs = z - m
    lse = jnp.log(jnp.sum(jnp.exp(zs), axis=-1, keepdims=True))
    out_ref[...] = (zs - lse).astype(out_ref.dtype)


def medium_model_forward(x, params, *, tile_b=1024):
    """x: (B, 784) float32; params: padded / transposed weights (see init_params)."""
    B = x.shape[0]
    # Batch tile: multiple of 16 (bf16 sublane packing), capped at the padded batch.
    tile_b = max(16, min(tile_b, _round_up(B, 16)))
    tile_b = _round_up(tile_b, 16)
    B_pad = _round_up(B, tile_b)
    if B_pad != B:
        x = jnp.pad(x, ((0, B_pad - B), (0, 0)))
    x = x.astype(jnp.bfloat16)
    n_tiles = B_pad // tile_b

    w1, b1 = params["w1"], params["b1"]
    w2, b2 = params["w2"], params["b2"]
    w3, b3 = params["w3"], params["b3"]

    # Weights / biases stay resident in VMEM across the whole batch grid.
    resident = lambda shape: pl.BlockSpec(shape, lambda i: (0, 0))

    weight_elems = IN_FEATURES * HIDDEN + HIDDEN * HIDDEN + HIDDEN * OUT_PAD
    cost = pl.CostEstimate(
        flops=2 * B_pad * weight_elems,
        transcendentals=B_pad * (OUT_PAD + 1),
        bytes_accessed=(B_pad * IN_FEATURES * 2          # x (bf16)
                        + B_pad * OUT_PAD * 4            # out (f32)
                        + weight_elems * 2               # bf16 weights
                        + (2 * HIDDEN + OUT_PAD) * 4),   # f32 biases
    )

    out = pl.pallas_call(
        _mlp_kernel,
        out_shape=jax.ShapeDtypeStruct((B_pad, OUT_PAD), jnp.float32),
        grid=(n_tiles,),
        in_specs=[
            pl.BlockSpec((tile_b, IN_FEATURES), lambda i: (i, 0)),
            resident(w1.shape), resident(b1.shape),
            resident(w2.shape), resident(b2.shape),
            resident(w3.shape), resident(b3.shape),
        ],
        out_specs=pl.BlockSpec((tile_b, OUT_PAD), lambda i: (i, 0)),
        compiler_params=pltpu.CompilerParams(
            dimension_semantics=("parallel",),
            vmem_limit_bytes=32 * 1024 * 1024,
        ),
        cost_estimate=cost,
    )(x, w1, b1, w2, b2, w3, b3)

    # Strip batch padding and the padded logit lanes.
    return out[:B, :N_CLASSES]


def init_params(key):
    """PyTorch nn.Linear-style init U(-1/sqrt(fan_in), 1/sqrt(fan_in)).
    Weights stored transposed (in, out), zero-padded to MXU/lane-friendly sizes,
    and cast to bf16 (biases stay f32).  Zero padding through ReLU leaves the
    real 200-dim / 10-class math unchanged."""
    real = [(IN_FEATURES, 200), (200, 200), (200, 10)]
    padded = [(IN_FEATURES, HIDDEN), (HIDDEN, HIDDEN), (HIDDEN, OUT_PAD)]
    params = {}
    for i, ((fin, fout), (pin, pout)) in enumerate(zip(real, padded), start=1):
        key, kw, kb = jax.random.split(key, 3)
        bound = 1.0 / float(fin) ** 0.5
        w = jax.random.uniform(kw, (fin, fout), jnp.float32, minval=-bound, maxval=bound)
        b = jax.random.uniform(kb, (fout,), jnp.float32, minval=-bound, maxval=bound)
        w_pad = jnp.zeros((pin, pout), jnp.float32).at[:fin, :fout].set(w)
        b_pad = jnp.zeros((1, pout), jnp.float32).at[0, :fout].set(b)
        params[f"w{i}"] = w_pad.astype(jnp.bfloat16)
        params[f"b{i}"] = b_pad
    return params


def reference_forward(x, params):
    """Pure-JAX reference using the exact same bf16-input / f32-accumulate math."""
    xb = x.astype(jnp.bfloat16)
    h1 = jnp.maximum(
        jnp.dot(xb, params["w1"], preferred_element_type=jnp.float32) + params["b1"], 0.0)
    h2 = jnp.maximum(
        jnp.dot(h1.astype(jnp.bfloat16), params["w2"],
                preferred_element_type=jnp.float32) + params["b2"], 0.0)
    z = jnp.dot(h2.astype(jnp.bfloat16), params["w3"],
                preferred_element_type=jnp.float32) + params["b3"]
    z = z[:, :N_CLASSES]
    return jax.nn.log_softmax(z, axis=-1)


if __name__ == "__main__":
    key = jax.random.PRNGKey(0)
    kp, kx = jax.random.split(key)
    params = init_params(kp)

    # Small, non-tile-aligned batch to exercise the batch grid + padding path.
    B = 50
    x = jax.random.normal(kx, (B, IN_FEATURES), jnp.float32)

    out = medium_model_forward(x, params, tile_b=16)   # grid of 4 batch tiles
    out = jax.block_until_ready(out)

    ref = reference_forward(x, params)
    assert out.shape == (B, N_CLASSES)
    assert jnp.allclose(out, ref, atol=1e-3, rtol=1e-3), "mismatch vs pure-JAX reference"

    print("KERNEL_OK")
</pallas_src>

<mosaic_0001>
module attributes {stable_mosaic.version = 11 : i64} {
  func.func @_mlp_kernel(%arg0: i32, %arg1: memref<16x784xbf16, #tpu.memory_space<vmem>>, %arg2: memref<784x256xbf16, #tpu.memory_space<vmem>>, %arg3: memref<1x256xf32, #tpu.memory_space<vmem>>, %arg4: memref<256x256xbf16, #tpu.memory_space<vmem>>, %arg5: memref<1x256xf32, #tpu.memory_space<vmem>>, %arg6: memref<256x128xbf16, #tpu.memory_space<vmem>>, %arg7: memref<1x128xf32, #tpu.memory_space<vmem>>, %arg8: memref<16x128xf32, #tpu.memory_space<vmem>>) attributes {dimension_semantics = [#tpu.dimension_semantics<parallel>], iteration_bounds = array<i64: 4>, scalar_prefetch = 0 : i64, scratch_operands = 0 : i64, tpu.core_type = #tpu.core_type<tc>, window_params = [{transform_indices = @transform_0, window_bounds = array<i64: 16, 784>}, {pipeline_mode = #tpu.pipeline_mode<synchronous>, transform_indices = @transform_1, window_bounds = array<i64: 784, 256>}, {pipeline_mode = #tpu.pipeline_mode<synchronous>, transform_indices = @transform_2, window_bounds = array<i64: 1, 256>}, {pipeline_mode = #tpu.pipeline_mode<synchronous>, transform_indices = @transform_3, window_bounds = array<i64: 256, 256>}, {pipeline_mode = #tpu.pipeline_mode<synchronous>, transform_indices = @transform_4, window_bounds = array<i64: 1, 256>}, {pipeline_mode = #tpu.pipeline_mode<synchronous>, transform_indices = @transform_5, window_bounds = array<i64: 256, 128>}, {pipeline_mode = #tpu.pipeline_mode<synchronous>, transform_indices = @transform_6, window_bounds = array<i64: 1, 128>}, {transform_indices = @transform_7, window_bounds = array<i64: 16, 128>}]} {
    %c0 = arith.constant 0 : index
    %c0_0 = arith.constant 0 : index
    %0 = vector.load %arg1[%c0, %c0_0] : memref<16x784xbf16, #tpu.memory_space<vmem>>, vector<16x784xbf16>
    %c0_1 = arith.constant 0 : index
    %c0_2 = arith.constant 0 : index
    %1 = vector.load %arg2[%c0_1, %c0_2] : memref<784x256xbf16, #tpu.memory_space<vmem>>, vector<784x256xbf16>
    %cst = arith.constant dense<0.000000e+00> : vector<16x256xf32>
    %2 = tpu.matmul %0, %1, %cst {dimension_numbers = #tpu.dot_dimension_numbers<[1], [0], [0], [1], [0, 0, 1, 1], [], []>} : vector<16x784xbf16>, vector<784x256xbf16>, vector<16x256xf32> -> vector<16x256xf32>
    %c0_3 = arith.constant 0 : index
    %c0_4 = arith.constant 0 : index
    %3 = vector.load %arg3[%c0_3, %c0_4] : memref<1x256xf32, #tpu.memory_space<vmem>>, vector<1x256xf32>
    %4 = vector.broadcast %3 : vector<1x256xf32> to vector<16x256xf32>
    %5 = arith.addf %2, %4 : vector<16x256xf32>
    %cst_5 = arith.constant 0.000000e+00 : f32
    %6 = vector.broadcast %cst_5 : f32 to vector<16x256xf32>
    %7 = arith.maximumf %5, %6 : vector<16x256xf32>
    %8 = arith.truncf %7 : vector<16x256xf32> to vector<16x256xbf16>
    %c0_6 = arith.constant 0 : index
    %c0_7 = arith.constant 0 : index
    %9 = vector.load %arg4[%c0_6, %c0_7] : memref<256x256xbf16, #tpu.memory_space<vmem>>, vector<256x256xbf16>
    %cst_8 = arith.constant dense<0.000000e+00> : vector<16x256xf32>
    %10 = tpu.matmul %8, %9, %cst_8 {dimension_numbers = #tpu.dot_dimension_numbers<[1], [0], [0], [1], [0, 0, 1, 1], [], []>} : vector<16x256xbf16>, vector<256x256xbf16>, vector<16x256xf32> -> vector<16x256xf32>
    %c0_9 = arith.constant 0 : index
    %c0_10 = arith.constant 0 : index
    %11 = vector.load %arg5[%c0_9, %c0_10] : memref<1x256xf32, #tpu.memory_space<vmem>>, vector<1x256xf32>
    %12 = vector.broadcast %11 : vector<1x256xf32> to vector<16x256xf32>
    %13 = arith.addf %10, %12 : vector<16x256xf32>
    %cst_11 = arith.constant 0.000000e+00 : f32
    %14 = vector.broadcast %cst_11 : f32 to vector<16x256xf32>
    %15 = arith.maximumf %13, %14 : vector<16x256xf32>
    %16 = arith.truncf %15 : vector<16x256xf32> to vector<16x256xbf16>
    %c0_12 = arith.constant 0 : index
    %c0_13 = arith.constant 0 : index
    %17 = vector.load %arg6[%c0_12, %c0_13] : memref<256x128xbf16, #tpu.memory_space<vmem>>, vector<256x128xbf16>
    %cst_14 = arith.constant dense<0.000000e+00> : vector<16x128xf32>
    %18 = tpu.matmul %16, %17, %cst_14 {dimension_numbers = #tpu.dot_dimension_numbers<[1], [0], [0], [1], [0, 0, 1, 1], [], []>} : vector<16x256xbf16>, vector<256x128xbf16>, vector<16x128xf32> -> vector<16x128xf32>
    %c0_15 = arith.constant 0 : index
    %c0_16 = arith.constant 0 : index
    %19 = vector.load %arg7[%c0_15, %c0_16] : memref<1x128xf32, #tpu.memory_space<vmem>>, vector<1x128xf32>
    %20 = vector.broadcast %19 : vector<1x128xf32> to vector<16x128xf32>
    %21 = arith.addf %18, %20 : vector<16x128xf32>
    %22 = tpu.iota {dimensions = array<i32: 1>} : vector<16x128xi32>
    %c10_i32 = arith.constant 10 : i32
    %23 = vector.broadcast %c10_i32 : i32 to vector<16x128xi32>
    %24 = arith.cmpi slt, %22, %23 : vector<16x128xi32>
    %cst_17 = arith.constant 0xFF800000 : f32
    %25 = vector.broadcast %cst_17 : f32 to vector<16x128xf32>
    %26 = arith.select %24, %21, %25 : vector<16x128xi1>, vector<16x128xf32>
    %cst_18 = arith.constant dense<0xFF800000> : vector<16xf32>
    %27 = vector.multi_reduction <maximumf>, %26, %cst_18 [1] : vector<16x128xf32> to vector<16xf32>
    %28 = vector.shape_cast %27 : vector<16xf32> to vector<16x1xf32>
    %29 = vector.broadcast %28 : vector<16x1xf32> to vector<16x128xf32>
    %30 = arith.subf %26, %29 : vector<16x128xf32>
    %31 = math.exp %30 : vector<16x128xf32>
    %cst_19 = arith.constant dense<0.000000e+00> : vector<16xf32>
    %32 = vector.multi_reduction <add>, %31, %cst_19 [1] : vector<16x128xf32> to vector<16xf32>
    %33 = vector.shape_cast %32 : vector<16xf32> to vector<16x1xf32>
    %34 = math.log %33 : vector<16x1xf32>
    %35 = vector.broadcast %34 : vector<16x1xf32> to vector<16x128xf32>
    %36 = arith.subf %30, %35 : vector<16x128xf32>
    %c0_20 = arith.constant 0 : index
    %c0_21 = arith.constant 0 : index
    %37 = vector.load %arg8[%c0_20, %c0_21] : memref<16x128xf32, #tpu.memory_space<vmem>>, vector<16x128xf32>
    tpu.vector_store %arg8[%c0_20, %c0_21], %36 {strides = array<i32>} : memref<16x128xf32, #tpu.memory_space<vmem>>, vector<16x128xf32>,
    return
  }
  func.func @transform_0(%arg0: i32) -> (i32, i32) {
    %c0_i32 = arith.constant 0 : i32
    %c0_i32_0 = arith.constant 0 : i32
    return %arg0, %c0_i32 : i32, i32
  }
  func.func @transform_1(%arg0: i32) -> (i32, i32) {
    %c0_i32 = arith.constant 0 : i32
    %c0_i32_0 = arith.constant 0 : i32
    %c0_i32_1 = arith.constant 0 : i32
    return %c0_i32, %c0_i32_0 : i32, i32
  }
  func.func @transform_2(%arg0: i32) -> (i32, i32) {
    %c0_i32 = arith.constant 0 : i32
    %c0_i32_0 = arith.constant 0 : i32
    %c0_i32_1 = arith.constant 0 : i32
    return %c0_i32, %c0_i32_0 : i32, i32
  }
  func.func @transform_3(%arg0: i32) -> (i32, i32) {
    %c0_i32 = arith.constant 0 : i32
    %c0_i32_0 = arith.constant 0 : i32
    %c0_i32_1 = arith.constant 0 : i32
    return %c0_i32, %c0_i32_0 : i32, i32
  }
  func.func @transform_4(%arg0: i32) -> (i32, i32) {
    %c0_i32 = arith.constant 0 : i32
    %c0_i32_0 = arith.constant 0 : i32
    %c0_i32_1 = arith.constant 0 : i32
    return %c0_i32, %c0_i32_0 : i32, i32
  }
  func.func @transform_5(%arg0: i32) -> (i32, i32) {
    %c0_i32 = arith.constant 0 : i32
    %c0_i32_0 = arith.constant 0 : i32
    %c0_i32_1 = arith.constant 0 : i32
    return %c0_i32, %c0_i32_0 : i32, i32
  }
  func.func @transform_6(%arg0: i32) -> (i32, i32) {
    %c0_i32 = arith.constant 0 : i32
    %c0_i32_0 = arith.constant 0 : i32
    %c0_i32_1 = arith.constant 0 : i32
    return %c0_i32, %c0_i32_0 : i32, i32
  }
  func.func @transform_7(%arg0: i32) -> (i32, i32) {
    %c0_i32 = arith.constant 0 : i32
    %c0_i32_0 = arith.constant 0 : i32
    return %arg0, %c0_i32 : i32, i32
  }
}

</mosaic_0001>

<bundles_post_ra>
// kernel: tpu_custom_call.1
= control target key start
LH: loop header
LB: loop body
LE: loop exit
PB: predicated region body
PF: predicated region fallthrough
CT: control target
= control target key end

     0   :  { %12 = vsyncpa [#allocation3], 0  ;;  %s2795_s0 = inlined_call_operand.hbm [shape: bf16[64,784], index: 0, kind: input, shape index: {}]   ;;  %s2796_s1 = inlined_call_operand.hbm [shape: bf16[784,256], index: 1, kind: input, shape index: {}]   ;;  %s2797_s2 = inlined_call_operand.vmem [shape: f32[1,256], index: 2, kind: input, shape index: {}]   ;;  %s2798_s3 = inlined_call_operand.hbm [shape: bf16[256,256], index: 3, kind: input, shape index: {}]   ;;  %s2799_s4 = inlined_call_operand.vmem [shape: f32[1,256], index: 4, kind: input, shape index: {}]   ;;  %s2800_s5 = inlined_call_operand.hbm [shape: bf16[256,128], index: 5, kind: input, shape index: {}]   ;;  %s2801_s6 = inlined_call_operand.vmem [shape: f32[1,128], index: 6, kind: input, shape index: {}]   ;;  %s2802_s7 = inlined_call_operand.hbm [shape: f32[64,128], index: 7, kind: output, shape index: {}]  }
   0x1   :  { %14 = vsyncpa [#allocation3 + $0x1], 0 }
   0x2   :  { %15 = vsyncpa [#allocation6], 0 }
   0x3   :  { %16 = vsyncpa [#allocation9], 0 }
   0x4   :  { %17 = vsyncpa [#allocation4], 0 }
   0x5   :  { %19 = vsyncpa [#allocation4 + $0x1], 0  ;;  %s2517_s24 = smov 0   ;;  %s2519_s25 = smov 0  }
   0x6   :  { %s2521_s26 = smov 0   ;;  %s2523_s27 = smov 0  }
   0x7 LB: > { %s2538_s28 = sadd.s32 4294967295, %s2461_s27   ;;  %s1742_s29 = sadd.s32 4294967294, %s2461_s27   ;;  %s2461_s27 = sphi %s2523_s27, %s2827_s27   ;;  %s2457_s26 = sphi %s2521_s26, %s2826_s26   ;;  %s2453_s25 = sphi %s2519_s25, %s2825_s25   ;;  %s2449_s24 = sphi %s2517_s24, %s2824_s24  }
   0x8   : > { %p45_p0 = scmp.ne.s32.totalorder %s2453_s25, %s2449_s24  ;;  %p2803_p1 = scmp.eq.s32.totalorder %s2538_s28, 0 }
   0x9   : > { %p201_p3 = scmp.eq.s32.totalorder %s1742_s29, 3  ;;  %p1743_p5 = scmp.ge.s32.totalorder %s2461_s27, 1 }
   0xa   : > { %p2547_p4 = por %p2803_p1, %p45_p0  ;;  %p208_p7 = scmp.lt.s32.totalorder %s2461_s27, 5 }
   0xb   : > { %p2552_p6 = por %p201_p3, %p45_p0  ;;  %s2463_s10 = smov [#allocation5]  }
   0xc   : > { %s2807_s30 = scalar_select %p2547_p4, 1, 0 }
   0xd   : > { %s2808_s8 = scalar_select %p2552_p6, 1, 0 }
   0xe   : > { %p2557_p8 = pnand %p1743_p5, %p208_p7  ;;  %s220_s11 = sshll.u32 %s2463_s10, 4  ;;  %s2561_s11 = int_to_ptr.vmem [resolvable:$true] %s220_s11 }
   0xf   : > { %2809 = sst [smem:[#allocation15_spill]] %s2808_s8  ;;  %s2464_s13 = smov [#allocation7]  }
  0x10   : > { %s2810_s9 = scalar_select %p2557_p8, 1, 0 }
  0x11   : > { %p1974_p9 = pneg %p2557_p8  ;;  %s236_s14 = sshll.u32 %s2464_s13, 4  ;;  %s2571_s14 = int_to_ptr.vmem [resolvable:$true] %s236_s14 }
  0x12   : > { %s2465_s15 = smov [#allocation8]   ;;  %s2273_s19 = scalar_lea.hbm %s2796_s1, 12544 }
  0x13   : > { %p2567_p10 = pnand %p1974_p9, %p2803_p1  ;;  %s2573_s16 = sshll.u32 %s2465_s15, 4  ;;  %s253_s16 = int_to_ptr.vmem [resolvable:$true] %s2573_s16 }
  0x14   : > { %p2274_p11 = scmp.ne.s32.totalorder %s2796_s1, %s2273_s19  ;;  %p2280_p3 = scmp.lt.u32.totalorder %s2273_s19, %s2796_s1 }
  0x15   : > { %p2583_p12 = pneg %p2567_p10 }
  0x17   : > { %p2276_p13 = pnand %p2583_p12, %p2274_p11 }
  0x19   : > { %p2277_p0 = pneg %p2276_p13 }
  0x1b   : > { %p2282_p5 = pnand %p2280_p3, %p2277_p0 }
  0x1d   : > { %2285 = shalt.err (!%p2282_p5)
}
  0x1e   : > { %s2286_s10 = scalar_lea.vmem %s2561_s11, 12544  ;;  %p2294_p2 = scmp.lt.s32.totalorder %s2561_s11, %s2561_s11 }
  0x1f   : > { %p2287_p7 = scmp.ne.s32.totalorder %s2561_s11, %s2286_s10  ;;  %p2295_p6 = scmp.lt.s32.totalorder %s2286_s10, %s2286_s10 }
  0x21   : > { %p2289_p9 = pnand %p2287_p7, %p2583_p12  ;;  %p2296_p11 = por %p2295_p6, %p2294_p2 }
  0x23   : > { %p2290_p1 = pneg %p2289_p9 }
  0x25   : > { %p2297_p13 = pnand %p2296_p11, %p2290_p1 }
  0x27   : > { %2300 = shalt.err (!%p2297_p13)
}
  0x28   : > { %s2466_s13 = smov 128   ;;  %s2467_s15 = smov 8  }
  0x29   : > { %1977 = dma.hbm_to_vmem [thread:$0]  (!%p2567_p10), %s2796_s1, 12544, %s2561_s11, [#allocation6], %s2466_s13, %s2466_s13, %s2467_s15  }
  0x2a   : > { %s2301_s21 = scalar_lea.hbm %s2798_s3, 4096 }
  0x2b   : > { %p2302_p2 = scmp.ne.s32.totalorder %s2798_s3, %s2301_s21  ;;  %p2308_p0 = scmp.lt.u32.totalorder %s2301_s21, %s2798_s3 }
  0x2d   : > { %p2304_p1 = pnand %p2302_p2, %p2583_p12 }
  0x2f   : > { %p2305_p6 = pneg %p2304_p1 }
  0x31   : > { %p2310_p3 = pnand %p2308_p0, %p2305_p6 }
  0x33   : > { %2313 = shalt.err (!%p2310_p3)
}
  0x34   : > { %s2314_s11 = scalar_lea.vmem %s2571_s14, 4096  ;;  %p2322_p11 = scmp.lt.s32.totalorder %s2571_s14, %s2571_s14 }
  0x35   : > { %p2315_p5 = scmp.ne.s32.totalorder %s2571_s14, %s2314_s11  ;;  %p2323_p13 = scmp.lt.s32.totalorder %s2314_s11, %s2314_s11 }
  0x37   : > { %p2317_p7 = pnand %p2315_p5, %p2583_p12  ;;  %p2324_p2 = por %p2323_p13, %p2322_p11 }
  0x39   : > { %p2318_p9 = pneg %p2317_p7 }
  0x3b   : > { %p2325_p1 = pnand %p2324_p2, %p2318_p9 }
  0x3d   : > { %2328 = shalt.err (!%p2325_p1)
}
  0x3e   : > { %1980 = dma.hbm_to_vmem [thread:$0]  (!%p2567_p10), %s2798_s3, 4096, %s2571_s14, [#allocation6], %s2466_s13, %s2466_s13, %s2467_s15  }
  0x3f   : > { %s2329_s20 = scalar_lea.hbm %s2800_s5, 2048 }
  0x40   : > { %p2330_p6 = scmp.ne.s32.totalorder %s2800_s5, %s2329_s20  ;;  %p2336_p5 = scmp.lt.u32.totalorder %s2329_s20, %s2800_s5 }
  0x42   : > { %p2332_p0 = pnand %p2330_p6, %p2583_p12 }
  0x44   : > { %p2333_p3 = pneg %p2332_p0 }
  0x46   : > { %p2338_p7 = pnand %p2336_p5, %p2333_p3 }
  0x48   : > { %2341 = shalt.err (!%p2338_p7)
}
  0x49   : > { %s2342_s11 = scalar_lea.vmem %s253_s16, 2048  ;;  %p2350_p2 = scmp.lt.s32.totalorder %s253_s16, %s253_s16 }
  0x4a   : > { %p2343_p9 = scmp.ne.s32.totalorder %s253_s16, %s2342_s11  ;;  %p2351_p1 = scmp.lt.s32.totalorder %s2342_s11, %s2342_s11 }
  0x4c   : > { %p2345_p11 = pnand %p2343_p9, %p2583_p12  ;;  %p2352_p4 = por %p2351_p1, %p2350_p2 }
  0x4e   : > { %p2346_p13 = pneg %p2345_p11 }
  0x50   : > { %p2353_p8 = pnand %p2352_p4, %p2346_p13 }
  0x52   : > { %2356 = shalt.err (!%p2353_p8)
}
  0x53   : > { %s2468_s14 = smov 64   ;;  %s2469_s22 = smov 4  }
  0x54   : > { %1983 = dma.hbm_to_vmem [thread:$0]  (!%p2567_p10), %s2800_s5, 2048, %s253_s16, [#allocation9], %s2468_s14, %s2468_s14, %s2469_s22  }
  0x55   : > { %s2647_s8 = sadd.s32 1, %s2461_s27   ;;  %s32_s18 = sadd.s32 1, %s2457_s26 }
  0x56   : > { %s29_s17 = ssub.s32 %s2461_s27, %s2647_s8  ;;  %p39_p8 = scmp.ne.s32.totalorder %s2457_s26, %s2453_s25 }
  0x57   : > { %p30_p4 = scmp.eq.s32.totalorder %s29_s17, 0  ;;  %p40_p12 = scmp.eq.s32.totalorder %s2461_s27, 0 }
  0x58   : > { %p1995_p6 = scmp.lt.s32.totalorder %s2461_s27, 4  ;;  %p2813_p3 = scmp.eq.s32.totalorder %s2538_s28, 3 }
  0x59   : > { %s2657_s19 = scalar_select %p30_p4, %s2457_s26, %s32_s18  }
  0x5a   : > { %p41_p0 = por %p40_p12, %p39_p8  ;;  %p2661_p5 = por %p2813_p3, %p39_p8 }
  0x5b   : > { %s269_s12 = sand.u32 1, %s2457_s26   ;;  %s1956_s21 = smul.u32 896, %s2461_s27 }
  0x5c   : > { %s1955_s16 = smul.u32 56, %s269_s12  ;;  %p2672_p10 = pnand %p1995_p6, %p41_p0 }
  0x5d   : > { %s2670_s10 = scalar_lea.hbm %s2795_s0, %s1956_s21  ;;  %s2678_s13 = scalar_lea.sflag [#allocation3], %s269_s12 }
  0x5e   : > { %s273_s14 = scalar_lea.vmem [#allocation2], %s1955_s16  ;;  %s2357_s15 = scalar_lea.hbm %s2670_s10, 896 }
  0x5f   : > { %s281_s22 = sshll.u32 %s273_s14, 4  ;;  %p2358_p7 = scmp.ne.s32.totalorder %s2670_s10, %s2357_s15  ;;  %s2676_s22 = int_to_ptr.vmem [resolvable:$true] %s281_s22 }
  0x60   : > { %p2359_p9 = pneg %p2672_p10  ;;  %s2362_s21 = scalar_lea.hbm %s2795_s0, 3584 }
  0x61   : > { %p2363_p2 = scmp.lt.u32.totalorder %s2670_s10, %s2795_s0  ;;  %p2364_p1 = scmp.lt.u32.totalorder %s2362_s21, %s2357_s15 }
  0x62   : > { %p2360_p11 = pnand %p2359_p9, %p2358_p7  ;;  %p2366_p8 = scmp.lt.u32.totalorder %s2357_s15, %s2670_s10 }
  0x63   : > { %p2365_p4 = por %p2364_p1, %p2363_p2 }
  0x64   : > { %p2361_p13 = pneg %p2360_p11 }
  0x65   : > { %p2367_p12 = por %p2366_p8, %p2365_p4 }
  0x67   : > { %p2368_p6 = pnand %p2367_p12, %p2361_p13 }
  0x69   : > { %2371 = shalt.err (!%p2368_p6)
}
  0x6a   : > { %s2372_s12 = scalar_lea.vmem %s2676_s22, 896  ;;  %s2470_s16 = smov [#allocation2]  }
  0x6b   : > { %p2373_p0 = scmp.ne.s32.totalorder %s2676_s22, %s2372_s12  ;;  %s2377_s14 = sshll.u32 %s2470_s16, 4  ;;  %s2378_s14 = int_to_ptr.vmem [resolvable:$false] %s2377_s14 }
  0x6c   : > { %s2379_s17 = scalar_lea.vmem %s2378_s14, 1792  ;;  %p2380_p11 = scmp.lt.s32.totalorder %s2676_s22, %s2378_s14 }
  0x6d   : > { %p2375_p3 = pnand %p2373_p0, %p2359_p9  ;;  %p2381_p2 = scmp.lt.s32.totalorder %s2379_s17, %s2372_s12 }
  0x6f   : > { %p2376_p7 = pneg %p2375_p3  ;;  %p2382_p1 = por %p2381_p2, %p2380_p11 }
  0x71   : > { %p2383_p4 = pnand %p2382_p1, %p2376_p7 }
  0x73   : > { %2386 = shalt.err (!%p2383_p4)
}
  0x74   : > { %s2471_s15 = smov 448   ;;  %s2472_s18 = smov 28  }
  0x75   : > { %1987 = dma.hbm_to_vmem [thread:$0]  (!%p2672_p10), %s2670_s10, 896, %s2676_s22, %s2678_s13, %s2471_s15, %s2471_s15, %s2472_s18  }
  0x76   : > { %p2816_p9 = scmp.ne.s32.totalorder %s2810_s9, 0 }
  0x77   : > { %s2709_s21 = sand.u32 (!%p2816_p9), 1, %s2453_s25   ;;  %p2817_p13 = scmp.ne.s32.totalorder (!%p2816_p9), %s2807_s30, 0 }
  0x78   : > { %293 = sbr.rel (%p2816_p9) target bundleno = 1271 (0x4f7), region = 48  ;;  %s296_s29 = scalar_lea.sflag (!%p2816_p9), [#allocation3], %s2709_s21 }
  0x79   : > { %s1957_s23 = smul.u32 (!%p2816_p9), 56, %s2709_s21 }
  0x7b   : > { %s2713_s12 = scalar_lea.vmem (!%p2816_p9), [#allocation2], %s1957_s23 }
  0x7f   : > { %2432 = dma.done.wait (%p2817_p13), %s296_s29, 896  }
  0x80   : > { %2434 = vsyncadd (%p2817_p13), %s296_s29, 4294966400  ;;  %p2818_p10 = scmp.eq.s32.totalorder %s2538_s28, 0 }
  0x82   : > { %2436 = dma.done.wait (%p2818_p10), [#allocation6], 16640   ;;  %p2819_p8 = pmov %p2818_p10 }
  0x84   : > { %2438 = vsyncadd (%p2819_p8), [#allocation6], 4294950656  ;;  %p2820_p12 = pmov %p2819_p8 }
  0x85   : > { %p2821_p6 = pmov %p2819_p8 }
  0x86   : > { %2440 = dma.done.wait (%p2820_p12), [#allocation9], 2048  }
  0x87   : > { %2442 = vsyncadd (%p2821_p6), [#allocation9], 4294965248  ;;  %v2044_v0 = vld [vmem:[#allocation5 + $0x104] ss:$8 sps:$4 sm:$0xff]   ;;  %v2046_v1 = vld [vmem:[#allocation5 + $0x100] ss:$8 sps:$4 sm:$0xff]  }
  0x88   : > { %1035 = vmatprep.subr.bf16.mxu0 %v2044_v0  ;;  %v2047_v2 = vld [vmem:[#allocation5 + $0x114] ss:$8 sps:$4 sm:$0xff]   ;;  %v2049_v3 = vld [vmem:[#allocation5 + $0x110] ss:$8 sps:$4 sm:$0xff]   ;;  %v2050_v4 = vld [vmem:[#allocation5 + $0x124] ss:$8 sps:$4 sm:$0xff]  }
  0x89   : > { %1036 = vmatpush1.bf16.msra.mxu0 %v2046_v1  ;;  %v2052_v5 = vld [vmem:[#allocation5 + $0x120] ss:$8 sps:$4 sm:$0xff]   ;;  %v2053_v6 = vld [vmem:[#allocation5 + $0x134] ss:$8 sps:$4 sm:$0xff]   ;;  %v2055_v7 = vld [vmem:[#allocation5 + $0x130] ss:$8 sps:$4 sm:$0xff]  }
  0x8a   : > { %1037 = vmatprep.subr.bf16.mxu0 %v2047_v2  ;;  %v2056_v8 = vld [vmem:[#allocation5 + $0x144] ss:$8 sps:$4 sm:$0xff]   ;;  %v2058_v9 = vld [vmem:[#allocation5 + $0x140] ss:$8 sps:$4 sm:$0xff]   ;;  %v2059_v10 = vld [vmem:[#allocation5 + $0x154] ss:$8 sps:$4 sm:$0xff]  }
  0x8b   : > { %v2061_v11 = vld [vmem:[#allocation5 + $0x150] ss:$8 sps:$4 sm:$0xff]   ;;  %v2062_v12 = vld [vmem:[#allocation5 + $0x164] ss:$8 sps:$4 sm:$0xff]   ;;  %v2064_v14 = vld [vmem:[#allocation5 + $0x160] ss:$8 sps:$4 sm:$0xff]  }
  0x8c   : > { %v2094_v13 = vld [vmem:[%s2713_s12 + $0xc] ss:$28 sps:$4 sm:$0xff]   ;;  %v2101_v16 = vld [vmem:[#allocation5 + $0x4] ss:$8 sps:$4 sm:$0xff]   ;;  %v2106_v19 = vld [vmem:[#allocation5] ss:$8 sps:$4 sm:$0xff]  }
  0x8d   : > { %1038 = vmatpush1.bf16.msra.mxu0 %v2049_v3  ;;  %v2065_v15 = vld [vmem:[#allocation5 + $0x174] ss:$8 sps:$4 sm:$0xff]   ;;  %1067 = vmatprep.mubr.bf16.mxu0 %v2094_v13  ;;  %v2067_v17 = vld [vmem:[#allocation5 + $0x170] ss:$8 sps:$4 sm:$0xff]   ;;  %v2068_v18 = vld [vmem:[#allocation5 + $0x184] ss:$8 sps:$4 sm:$0xff]  }
  0x8e   : > { %1039 = vmatprep.subr.bf16.mxu0 %v2050_v4  ;;  %992 = vmatprep.subr.bf16.mxu1 %v2101_v16  ;;  %v2107_v20 = vld [vmem:[#allocation5 + $0x14] ss:$8 sps:$4 sm:$0xff]   ;;  %v2070_v21 = vld [vmem:[#allocation5 + $0x180] ss:$8 sps:$4 sm:$0xff]   ;;  %v2112_v22 = vld [vmem:[#allocation5 + $0x10] ss:$8 sps:$4 sm:$0xff]  }
  0x8f   : > { %993 = vmatpush1.bf16.msra.mxu1 %v2106_v19  ;;  %v2113_v23 = vld [vmem:[#allocation5 + $0x24] ss:$8 sps:$4 sm:$0xff]   ;;  %v2071_v24 = vld [vmem:[#allocation5 + $0x194] ss:$8 sps:$4 sm:$0xff]   ;;  %v2118_v25 = vld [vmem:[#allocation5 + $0x20] ss:$8 sps:$4 sm:$0xff]  }
  0x90   : > { %994 = vmatprep.subr.bf16.mxu1 %v2107_v20  ;;  %v2119_v26 = vld [vmem:[#allocation5 + $0x34] ss:$8 sps:$4 sm:$0xff]   ;;  %v2073_v27 = vld [vmem:[#allocation5 + $0x190] ss:$8 sps:$4 sm:$0xff]   ;;  %v2074_v28 = vld [vmem:[#allocation5 + $0x1a4] ss:$8 sps:$4 sm:$0xff]  }
  0x91   : > { %1040 = vmatpush1.bf16.msra.mxu0 %v2052_v5  ;;  %v2124_v29 = vld [vmem:[#allocation5 + $0x30] ss:$8 sps:$4 sm:$0xff]   ;;  %v2125_v30 = vld [vmem:[#allocation5 + $0x44] ss:$8 sps:$4 sm:$0xff]   ;;  %v2076_v31 = vld [vmem:[#allocation5 + $0x1a0] ss:$8 sps:$4 sm:$0xff]  }
  0x92   : > { %1041 = vmatprep.subr.bf16.mxu0 %v2053_v6  ;;  %v2077_v32 = vld [vmem:[#allocation5 + $0x1b4] ss:$8 sps:$4 sm:$0xff]   ;;  %v2130_v33 = vld [vmem:[#allocation5 + $0x40] ss:$8 sps:$4 sm:$0xff]   ;;  %v2079_v35 = vld [vmem:[#allocation5 + $0x1b0] ss:$8 sps:$4 sm:$0xff]  }
  0x93   : > { %995 = vmatpush1.bf16.msra.mxu1 %v2112_v22  ;;  %v2131_v34 = vld [vmem:[#allocation5 + $0x54] ss:$8 sps:$4 sm:$0xff]   ;;  %v2080_v36 = vld [vmem:[#allocation5 + $0x1c4] ss:$8 sps:$4 sm:$0xff]   ;;  %v2136_v37 = vld [vmem:[#allocation5 + $0x50] ss:$8 sps:$4 sm:$0xff]  }
  0x94   : > { %996 = vmatprep.subr.bf16.mxu1 %v2113_v23  ;;  %v2137_v38 = vld [vmem:[#allocation5 + $0x64] ss:$8 sps:$4 sm:$0xff]   ;;  %v2082_v39 = vld [vmem:[#allocation5 + $0x1c0] ss:$8 sps:$4 sm:$0xff]   ;;  %v2083_v40 = vld [vmem:[#allocation5 + $0x1d4] ss:$8 sps:$4 sm:$0xff]  }
  0x95   : > { %1042 = vmatpush1.bf16.msra.mxu0 %v2055_v7  ;;  %v2142_v41 = vld [vmem:[#allocation5 + $0x60] ss:$8 sps:$4 sm:$0xff]   ;;  %v2143_v42 = vld [vmem:[#allocation5 + $0x74] ss:$8 sps:$4 sm:$0xff]   ;;  %v2085_v43 = vld [vmem:[#allocation5 + $0x1d0] ss:$8 sps:$4 sm:$0xff]  }
  0x96   : > { %1043 = vmatprep.subr.bf16.mxu0 %v2056_v8  ;;  %v2086_v44 = vld [vmem:[#allocation5 + $0x1e4] ss:$8 sps:$4 sm:$0xff]   ;;  %v2148_v45 = vld [vmem:[#allocation5 + $0x70] ss:$8 sps:$4 sm:$0xff]   ;;  %v2088_v47 = vld [vmem:[#allocation5 + $0x1e0] ss:$8 sps:$4 sm:$0xff]  }
  0x97   : > { %997 = vmatpush1.bf16.msra.mxu1 %v2118_v25  ;;  %v2149_v46 = vld [vmem:[#allocation5 + $0x84] ss:$8 sps:$4 sm:$0xff]   ;;  %v2089_v48 = vld [vmem:[#allocation5 + $0x1f4] ss:$8 sps:$4 sm:$0xff]   ;;  %v2154_v49 = vld [vmem:[#allocation5 + $0x80] ss:$8 sps:$4 sm:$0xff]  }
  0x98   : > { %998 = vmatprep.subr.bf16.mxu1 %v2119_v26  ;;  %v2155_v50 = vld [vmem:[#allocation5 + $0x94] ss:$8 sps:$4 sm:$0xff]   ;;  %v2091_v51 = vld [vmem:[#allocation5 + $0x1f0] ss:$8 sps:$4 sm:$0xff]   ;;  %v2097_v52 = vld [vmem:[#allocation5 + $0x204] ss:$8 sps:$4 sm:$0xff]  }
  0x99   : > { %1044 = vmatpush1.bf16.msra.mxu0 %v2058_v9  ;;  %v2160_v53 = vld [vmem:[#allocation5 + $0x90] ss:$8 sps:$4 sm:$0xff]   ;;  %v2161_v55 = vld [vmem:[#allocation5 + $0xa4] ss:$8 sps:$4 sm:$0xff]   ;;  %v2095_v56 = vld [vmem:[#allocation5 + $0x200] ss:$8 sps:$4 sm:$0xff]  }
  0x9a   : > { %1045 = vmatprep.subr.bf16.mxu0 %v2059_v10  ;;  %v2092_v54 = vld [vmem:[%s2713_s12 + $0x8] ss:$28 sps:$4 sm:$0xff]   ;;  %v2187_v57 = vld [vmem:[%s2713_s12 + $0x14] ss:$28 sps:$4 sm:$0xff]   ;;  %v2197_v20 = vld [vmem:[%s2713_s12] ss:$28 sps:$4 sm:$0xff]  }
  0x9b   : > { %999 = vmatpush1.bf16.msra.mxu1 %v2124_v29  ;;  %v2100_v58 = vld [vmem:[#allocation5 + $0x214] ss:$8 sps:$4 sm:$0xff]   ;;  %v2166_v59 = vld [vmem:[#allocation5 + $0xa0] ss:$8 sps:$4 sm:$0xff]   ;;  %v2098_v61 = vld [vmem:[#allocation5 + $0x210] ss:$8 sps:$4 sm:$0xff]  }
  0x9c   : > { %1000 = vmatprep.subr.bf16.mxu1 %v2125_v30  ;;  %v2167_v60 = vld [vmem:[#allocation5 + $0xb4] ss:$8 sps:$4 sm:$0xff]   ;;  %v2105_v62 = vld [vmem:[#allocation5 + $0x224] ss:$8 sps:$4 sm:$0xff]   ;;  %v2172_v63 = vld [vmem:[#allocation5 + $0xb0] ss:$8 sps:$4 sm:$0xff]  }
  0x9d   : > { %1046 = vmatpush1.bf16.msra.mxu0 %v2061_v11  ;;  %v2199_v0 = vld [vmem:[%s2713_s12 + $0x4] ss:$28 sps:$4 sm:$0xff]   ;;  %vm988_vm0 = vcmask 130048   ;;  %s1755_s16 = sshll.u32 %s2709_s21, 4  ;;  %s1916_s15 = sshll.u32 %s2538_s28, 8 }
  0x9e   : > { %1047 = vmatprep.subr.bf16.mxu0 %v2062_v12  ;;  %v2173_v1 = vld [vmem:[#allocation5 + $0xc4] ss:$8 sps:$4 sm:$0xff]   ;;  %v2103_v2 = vld [vmem:[#allocation5 + $0x220] ss:$8 sps:$4 sm:$0xff]   ;;  %1024 = vmatprep.mubr.bf16.mxu1 %v2199_v0  ;;  %v2111_v3 = vld [vmem:[#allocation5 + $0x234] ss:$8 sps:$4 sm:$0xff]   ;;  %s2752_s29 = scalar_lea.hbm %s2802_s7, %s1916_s15 }
  0x9f   : > { %1001 = vmatpush1.bf16.msra.mxu1 %v2130_v33  ;;  %v2178_v4 = vld [vmem:[#allocation5 + $0xc0] ss:$8 sps:$4 sm:$0xff]   ;;  %v2179_v5 = vld [vmem:[#allocation5 + $0xd4] ss:$8 sps:$4 sm:$0xff]   ;;  %v2109_v6 = vld [vmem:[#allocation5 + $0x230] ss:$8 sps:$4 sm:$0xff]  }
  0xa0   : > { %1002 = vmatprep.subr.bf16.mxu1 %v2131_v34  ;;  %v2117_v7 = vld [vmem:[#allocation5 + $0x244] ss:$8 sps:$4 sm:$0xff]   ;;  %v2184_v8 = vld [vmem:[#allocation5 + $0xd0] ss:$8 sps:$4 sm:$0xff]   ;;  %v2115_v10 = vld [vmem:[#allocation5 + $0x240] ss:$8 sps:$4 sm:$0xff]  }
  0xa1   : > { %1048 = vmatpush1.bf16.msra.mxu0 %v2064_v14  ;;  %v2188_v9 = vld [vmem:[#allocation5 + $0xe4] ss:$8 sps:$4 sm:$0xff]   ;;  %v2123_v11 = vld [vmem:[#allocation5 + $0x254] ss:$8 sps:$4 sm:$0xff]   ;;  %v2193_v12 = vld [vmem:[#allocation5 + $0xe0] ss:$8 sps:$4 sm:$0xff]  }
  0xa2   : > { %1049 = vmatprep.subr.bf16.mxu0 %v2065_v15  ;;  %v2194_v13 = vld [vmem:[#allocation5 + $0xf4] ss:$8 sps:$4 sm:$0xff]   ;;  %v2121_v14 = vld [vmem:[#allocation5 + $0x250] ss:$8 sps:$4 sm:$0xff]   ;;  %v2129_v15 = vld [vmem:[#allocation5 + $0x264] ss:$8 sps:$4 sm:$0xff]  }
  0xa3   : > { %1003 = vmatpush1.bf16.msra.mxu1 %v2136_v37  ;;  %v2127_v16 = vld [vmem:[#allocation5 + $0x260] ss:$8 sps:$4 sm:$0xff]   ;;  %v2135_v19 = vld [vmem:[#allocation5 + $0x274] ss:$8 sps:$4 sm:$0xff]   ;;  %v2206_v22 = vld [vmem:[#allocation7 + $0x14] ss:$8 sps:$4 sm:$0xff]  }
  0xa4   : > { %1004 = vmatprep.subr.bf16.mxu1 %v2137_v38  ;;  %v2133_v23 = vld [vmem:[#allocation5 + $0x270] ss:$8 sps:$4 sm:$0xff]   ;;  %v2204_v25 = vld [vmem:[#allocation7 + $0x10] ss:$8 sps:$4 sm:$0xff]   ;;  %v2209_v26 = vld [vmem:[#allocation7 + $0x24] ss:$8 sps:$4 sm:$0xff]  }
  0xa5   : > { %1050 = vmatpush1.bf16.msra.mxu0 %v2067_v17  ;;  %v2196_v17 = vld [vmem:[#allocation5 + $0xf0] ss:$8 sps:$4 sm:$0xff]   ;;  %v2212_v30 = vld [vmem:[#allocation7 + $0x34] ss:$8 sps:$4 sm:$0xff]   ;;  %v2210_v33 = vld [vmem:[#allocation7 + $0x30] ss:$8 sps:$4 sm:$0xff]  }
  0xa6   : > { %1051 = vmatprep.subr.bf16.mxu0 %v2068_v18  ;;  %v2203_v18 = vld [vmem:[#allocation7 + $0x4] ss:$8 sps:$4 sm:$0xff]   ;;  %v2207_v29 = vld [vmem:[#allocation7 + $0x20] ss:$8 sps:$4 sm:$0xff]   ;;  %v2218_v38 = vld [vmem:[#allocation7 + $0x54] ss:$8 sps:$4 sm:$0xff]  }
  0xa7   : > { %1005 = vmatpush1.bf16.msra.mxu1 %v2142_v41  ;;  %v2215_v34 = vld [vmem:[#allocation7 + $0x44] ss:$8 sps:$4 sm:$0xff]   ;;  %v2213_v37 = vld [vmem:[#allocation7 + $0x40] ss:$8 sps:$4 sm:$0xff]   ;;  %v2216_v41 = vld [vmem:[#allocation7 + $0x50] ss:$8 sps:$4 sm:$0xff]  }
  0xa8   : > { %1006 = vmatprep.subr.bf16.mxu1 %v2143_v42  ;;  %v2221_v42 = vld [vmem:[#allocation7 + $0x64] ss:$8 sps:$4 sm:$0xff]   ;;  %v2234_v0 = vld [vmem:[#allocation7 + $0xb0] ss:$8 sps:$4 sm:$0xff]   ;;  %s341_s14 = scalar_lea.vmem [#allocation10], %s1755_s16  ;;  %s2474_s28 = smov [#allocation10]  }
  0xa9   : > { %1052 = vmatpush1.bf16.msra.mxu0 %v2070_v21  ;;  %v2201_v21 = vld [vmem:[#allocation7] ss:$8 sps:$4 sm:$0xff]   ;;  %s1640_s17 = sshll.u32 %s341_s14, 4  ;;  %s2391_s9 = sshll.u32 %s2474_s28, 4  ;;  %s2747_s17 = int_to_ptr.vmem [resolvable:$true] %s1640_s17  ;;  %s2392_s9 = int_to_ptr.vmem [resolvable:$false] %s2391_s9 }
  0xaa   : > { %1053 = vmatprep.subr.bf16.mxu0 %v2071_v24  ;;  %v2141_v24 = vld [vmem:[#allocation5 + $0x284] ss:$8 sps:$4 sm:$0xff]   ;;  %s2387_s30 = scalar_lea.vmem %s2747_s17, 256  ;;  %s2393_s10 = scalar_lea.vmem %s2392_s9, 512 }
  0xab   : > { %1007 = vmatpush1.bf16.msra.mxu1 %v2148_v45  ;;  %v2219_v45 = vld [vmem:[#allocation7 + $0x60] ss:$8 sps:$4 sm:$0xff]   ;;  %p2388_p0 = scmp.ne.s32.totalorder %s2747_s17, %s2387_s30  ;;  %p2394_p11 = scmp.lt.s32.totalorder %s2747_s17, %s2392_s9 }
  0xac   : > { %1008 = vmatprep.subr.bf16.mxu1 %v2149_v46  ;;  %v2224_v46 = vld [vmem:[#allocation7 + $0x74] ss:$8 sps:$4 sm:$0xff]   ;;  %p2395_p2 = scmp.lt.s32.totalorder %s2393_s10, %s2387_s30 }
  0xad   : > { %1054 = vmatpush1.bf16.msra.mxu0 %v2073_v27  ;;  %v2139_v27 = vld [vmem:[#allocation5 + $0x280] ss:$8 sps:$4 sm:$0xff]   ;;  %p2389_p3 = pnand %p2388_p0, %p2661_p5 }
  0xae   : > { %1055 = vmatprep.subr.bf16.mxu0 %v2074_v28  ;;  %v2147_v28 = vld [vmem:[#allocation5 + $0x294] ss:$8 sps:$4 sm:$0xff]   ;;  %p2396_p1 = por %p2395_p2, %p2394_p11 }
  0xaf   : > { %1009 = vmatpush1.bf16.msra.mxu1 %v2154_v49  ;;  %v2222_v49 = vld [vmem:[#allocation7 + $0x70] ss:$8 sps:$4 sm:$0xff]   ;;  %p2390_p7 = pneg %p2389_p3 }
  0xb0   : > { %1010 = vmatprep.subr.bf16.mxu1 %v2155_v50  ;;  %v2227_v50 = vld [vmem:[#allocation7 + $0x84] ss:$8 sps:$4 sm:$0xff]  }
  0xb1   : > { %1056 = vmatpush1.bf16.msra.mxu0 %v2076_v31  ;;  %v2145_v31 = vld [vmem:[#allocation5 + $0x290] ss:$8 sps:$4 sm:$0xff]   ;;  %p2397_p4 = pnand %p2396_p1, %p2390_p7 }
  0xb2   : > { %1057 = vmatprep.subr.bf16.mxu0 %v2077_v32  ;;  %v2153_v32 = vld [vmem:[#allocation5 + $0x2a4] ss:$8 sps:$4 sm:$0xff]  }
  0xb3   : > { %1011 = vmatpush1.bf16.msra.mxu1 %v2160_v53  ;;  %v2225_v53 = vld [vmem:[#allocation7 + $0x80] ss:$8 sps:$4 sm:$0xff]  }
  0xb4   : > { %1012 = vmatprep.subr.bf16.mxu1 %v2161_v55  ;;  %v2181_v55 = vld [vmem:[#allocation5 + $0x2f0] ss:$8 sps:$4 sm:$0xff]  }
  0xb5   : > { %1058 = vmatpush1.bf16.msra.mxu0 %v2079_v35  ;;  %v2151_v35 = vld [vmem:[#allocation5 + $0x2a0] ss:$8 sps:$4 sm:$0xff]  }
  0xb6   : > { %1059 = vmatprep.subr.bf16.mxu0 %v2080_v36  ;;  %v2159_v36 = vld [vmem:[#allocation5 + $0x2b4] ss:$8 sps:$4 sm:$0xff]  }
  0xb7   : > { %1013 = vmatpush1.bf16.msra.mxu1 %v2166_v59  ;;  %v2233_v59 = vld [vmem:[#allocation7 + $0xa4] ss:$8 sps:$4 sm:$0xff]  }
  0xb8   : > { %1014 = vmatprep.subr.bf16.mxu1 %v2167_v60  ;;  %v2190_v60 = vld [vmem:[#allocation5 + $0x300] ss:$8 sps:$4 sm:$0xff]  }
  0xb9   : > { %1060 = vmatpush1.bf16.msra.mxu0 %v2082_v39  ;;  %v2157_v39 = vld [vmem:[#allocation5 + $0x2b0] ss:$8 sps:$4 sm:$0xff]  }
  0xba   : > { %1061 = vmatprep.subr.bf16.mxu0 %v2083_v40  ;;  %v2165_v40 = vld [vmem:[#allocation5 + $0x2c4] ss:$8 sps:$4 sm:$0xff]  }
  0xbb   : > { %1015 = vmatpush1.bf16.msra.mxu1 %v2172_v63  ;;  %v2473_v63 = vmov 0  }
  0xbc   : > { %1016 = vmatprep.subr.bf16.mxu1 %v2173_v1  ;;  %v2239_v1 = vld [vmem:[#allocation7 + $0xc4] ss:$8 sps:$4 sm:$0xff]  }
  0xbd   : > { %1062 = vmatpush1.bf16.msra.mxu0 %v2085_v43  ;;  %v2163_v43 = vld [vmem:[#allocation5 + $0x2c0] ss:$8 sps:$4 sm:$0xff]  }
  0xbe   : > { %1063 = vmatprep.subr.bf16.mxu0 %v2086_v44  ;;  %v2171_v44 = vld [vmem:[#allocation5 + $0x2d4] ss:$8 sps:$4 sm:$0xff]  }
  0xbf   : > { %1017 = vmatpush1.bf16.msra.mxu1 %v2178_v4  ;;  %v2240_v4 = vld [vmem:[#allocation7 + $0xd0] ss:$8 sps:$4 sm:$0xff]  }
  0xc0   : > { %1018 = vmatprep.subr.bf16.mxu1 %v2179_v5  ;;  %v2242_v5 = vld [vmem:[#allocation7 + $0xd4] ss:$8 sps:$4 sm:$0xff]  }
  0xc1   : > { %1064 = vmatpush1.bf16.msra.mxu0 %v2088_v47  ;;  %v2169_v47 = vld [vmem:[#allocation5 + $0x2d0] ss:$8 sps:$4 sm:$0xff]  }
  0xc2   : > { %1065 = vmatprep.subr.bf16.mxu0 %v2089_v48  ;;  %v2177_v48 = vld [vmem:[#allocation5 + $0x2e4] ss:$8 sps:$4 sm:$0xff]  }
  0xc3   : > { %1019 = vmatpush1.bf16.msra.mxu1 %v2184_v8  ;;  %v2248_v8 = vld [vmem:[#allocation7 + $0xf4] ss:$8 sps:$4 sm:$0xff]  }
  0xc4   : > { %1020 = vmatprep.subr.bf16.mxu1 %v2188_v9  ;;  %v2246_v9 = vld [vmem:[#allocation7 + $0xf0] ss:$8 sps:$4 sm:$0xff]  }
  0xc5   : > { %1066 = vmatpush1.bf16.msra.mxu0 %v2091_v51  ;;  %v2175_v51 = vld [vmem:[#allocation5 + $0x2e0] ss:$8 sps:$4 sm:$0xff]  }
  0xc6   : > { %1078 = vmatprep.subr.bf16.mxu0 %v2097_v52  ;;  %v2183_v52 = vld [vmem:[#allocation5 + $0x2f4] ss:$8 sps:$4 sm:$0xff]  }
  0xc7   : > { %1021 = vmatpush1.bf16.msra.mxu1 %v2193_v12 }
  0xc8   : > { %1068 = vmatmul.mubr.bf16.vlgmr.msra.gmra.mrb[0].mxu0 %v2092_v54  ;;  %1022 = vmatprep.subr.bf16.mxu1 %v2194_v13  ;;  %v2230_v54 = vld [vmem:[#allocation7 + $0x94] ss:$8 sps:$4 sm:$0xff]  }
  0xc9   : > { %1079 = vmatpush1.bf16.msra.mxu0 %v2095_v56  ;;  %1110 = vmatprep.mubr.bf16.mxu0 %v2187_v57  ;;  %v2192_v56 = vld [vmem:[#allocation5 + $0x304] ss:$8 sps:$4 sm:$0xff]   ;;  %v2228_v57 = vld [vmem:[#allocation7 + $0x90] ss:$8 sps:$4 sm:$0xff]  }
  0xca   : > { %1080 = vmatprep.subr.bf16.mxu0 %v2100_v58  ;;  %v2185_v58 = vld [vmem:[%s2713_s12 + $0x10] ss:$28 sps:$4 sm:$0xff]  }
  0xcb   : > { %1023 = vmatpush1.bf16.msra.mxu1 %v2196_v17 }
  0xcc   : > { %1374 = vmatprep.subr.bf16.mxu1 %v2203_v18  ;;  %v451_v18 = vld [vmem:[%s2797_s2] sm:$0x3] }
  0xcd   : > { %1081 = vmatpush1.bf16.msra.mxu0 %v2098_v61  ;;  %v2231_v61 = vld [vmem:[#allocation7 + $0xa0] ss:$8 sps:$4 sm:$0xff]  }
  0xce   : > { %1082 = vmatprep.subr.bf16.mxu0 %v2105_v62  ;;  %1025 = vmatmul.mubr.bf16.vlgmr.msra.gmra.mrb[0].mxu1 %v2197_v20  ;;  %v2236_v62 = vld [vmem:[#allocation7 + $0xb4] ss:$8 sps:$4 sm:$0xff]  }
  0xcf   : > { %1375 = vmatpush1.bf16.msra.mxu1 %v2201_v21 }
  0xd0   : > { %1376 = vmatprep.subr.bf16.mxu1 %v2206_v22 }
  0xd1   : > { %1083 = vmatpush1.bf16.msra.mxu0 %v2103_v2  ;;  %v2237_v2 = vld [vmem:[#allocation7 + $0xc0] ss:$8 sps:$4 sm:$0xff]  }
  0xd2   : > { %1084 = vmatprep.subr.bf16.mxu0 %v2111_v3  ;;  %v2200_v3 = vld [vmem:[%s2713_s12 + $0x18] ss:$28 sps:$4 sm:$0xff]   ;;  %s1627_s12 = scalar_lea.sflag [#allocation4], %s2709_s21 }
  0xd3   : > { %1377 = vmatpush1.bf16.msra.mxu1 %v2204_v25 }
  0xd4   : > { %1378 = vmatprep.subr.bf16.mxu1 %v2209_v26 }
  0xd5   : > { %1085 = vmatpush1.bf16.msra.mxu0 %v2109_v6  ;;  %v2245_v6 = vld [vmem:[#allocation7 + $0xe4] ss:$8 sps:$4 sm:$0xff]  }
  0xd6   : > { %1086 = vmatprep.subr.bf16.mxu0 %v2117_v7  ;;  %v2243_v7 = vld [vmem:[#allocation7 + $0xe0] ss:$8 sps:$4 sm:$0xff]  }
  0xd7   : > { %1379 = vmatpush1.bf16.msra.mxu1 %v2207_v29 }
  0xd8   : > { %1380 = vmatprep.subr.bf16.mxu1 %v2212_v30 }
  0xd9   : > { %1087 = vmatpush1.bf16.msra.mxu0 %v2115_v10  ;;  %v2249_v10 = vld [vmem:[#allocation8 + $0x40] sm:$0xff]  }
  0xda   : > { %1088 = vmatprep.subr.bf16.mxu0 %v2123_v11 }
  0xdb   : > { %1381 = vmatpush1.bf16.msra.mxu1 %v2210_v33 }
  0xdc   : > { %1382 = vmatprep.subr.bf16.mxu1 %v2215_v34 }
  0xdd   : > { %1089 = vmatpush1.bf16.msra.mxu0 %v2121_v14 }
  0xde   : > { %1090 = vmatprep.subr.bf16.mxu0 %v2129_v15  ;;  %v453_v15 = vlaneseq }
  0xdf   : > { %1383 = vmatpush1.bf16.msra.mxu1 %v2213_v37 }
  0xe0   : > { %1384 = vmatprep.subr.bf16.mxu1 %v2218_v38 }
  0xe1   : > { %1091 = vmatpush1.bf16.msra.mxu0 %v2127_v16  ;;  %v454_v16 = vshrl.u32 %v453_v15, 7 }
  0xe2   : > { %1092 = vmatprep.subr.bf16.mxu0 %v2135_v19 }
  0xe3   : > { %1385 = vmatpush1.bf16.msra.mxu1 %v2216_v41  ;;  %v455_v17 = vsub.s32 0, %v454_v16  ;;  %v459_v19 = vsub.s32 1, %v454_v16  ;;  %v2251_v41 = vld [vmem:[#allocation8 + $0x48] sm:$0xff]  }
  0xe4   : > { %1386 = vmatprep.subr.bf16.mxu1 %v2221_v42  ;;  %v2252_v42 = vld [vmem:[#allocation8 + $0x8] sm:$0xff]  }
  0xe5   : > { %1093 = vmatpush1.bf16.msra.mxu0 %v2133_v23  ;;  %v456_v20 = vrot.slane %v451_v18, %v455_v17  ;;  %v460_v21 = vrot.slane %v451_v18, %v459_v19 }
  0xe6   : > { %1094 = vmatprep.subr.bf16.mxu0 %v2141_v24 }
  0xe7   : > { %1387 = vmatpush1.bf16.msra.mxu1 %v2219_v45  ;;  %v2255_v45 = vld [vmem:[#allocation8 + $0x58] sm:$0xff]  }
  0xe8   : > { %1388 = vmatprep.subr.bf16.mxu1 %v2224_v46  ;;  %v2256_v46 = vld [vmem:[#allocation8 + $0x18] sm:$0xff]  }
  0xe9   : > { %1095 = vmatpush1.bf16.msra.mxu0 %v2139_v27 }
  0xea   : > { %1096 = vmatprep.subr.bf16.mxu0 %v2147_v28 }
  0xeb   : > { %1389 = vmatpush1.bf16.msra.mxu1 %v2222_v49  ;;  %v2259_v49 = vld [vmem:[#allocation8 + $0x68] sm:$0xff]  }
  0xec   : > { %1390 = vmatprep.subr.bf16.mxu1 %v2227_v50  ;;  %v2260_v50 = vld [vmem:[#allocation8 + $0x28] sm:$0xff]  }
  0xed   : > { %1097 = vmatpush1.bf16.msra.mxu0 %v2145_v31 }
  0xee   : > { %1098 = vmatprep.subr.bf16.mxu0 %v2153_v32 }
  0xef   : > { %1391 = vmatpush1.bf16.msra.mxu1 %v2225_v53  ;;  %v2263_v53 = vld [vmem:[#allocation8 + $0x78] sm:$0xff]  }
  0xf0   : > { %1392 = vmatprep.subr.bf16.mxu1 %v2230_v54  ;;  %v2264_v54 = vld [vmem:[#allocation8 + $0x38] sm:$0xff]  }
  0xf1   : > { %1099 = vmatpush1.bf16.msra.mxu0 %v2151_v35 }
  0xf2   : > { %1100 = vmatprep.subr.bf16.mxu0 %v2159_v36 }
  0xf3   : > { %1393 = vmatpush1.bf16.msra.mxu1 %v2228_v57 }
  0xf4   : > { %1394 = vmatprep.subr.bf16.mxu1 %v2233_v59 }
  0xf5   : > { %1101 = vmatpush1.bf16.msra.mxu0 %v2157_v39 }
  0xf6   : > { %1102 = vmatprep.subr.bf16.mxu0 %v2165_v40  ;;  %v2250_v40 = vld [vmem:[#allocation8] sm:$0xff]  }
  0xf7   : > { %1395 = vmatpush1.bf16.msra.mxu1 %v2231_v61 }
  0xf8   : > { %1396 = vmatprep.subr.bf16.mxu1 %v2236_v62 }
  0xf9   : > { %1103 = vmatpush1.bf16.msra.mxu0 %v2163_v43  ;;  %v2253_v43 = vld [vmem:[#allocation8 + $0x50] sm:$0xff]  }
  0xfa   : > { %1104 = vmatprep.subr.bf16.mxu0 %v2171_v44  ;;  %v2254_v44 = vld [vmem:[#allocation8 + $0x10] sm:$0xff]  }
  0xfb   : > { %1397 = vmatpush1.bf16.msra.mxu1 %v2234_v0 }
  0xfc   : > { %1398 = vmatprep.subr.bf16.mxu1 %v2239_v1 }
  0xfd   : > { %1105 = vmatpush1.bf16.msra.mxu0 %v2169_v47  ;;  %v2257_v47 = vld [vmem:[#allocation8 + $0x60] sm:$0xff]  }
  0xfe   : > { %1106 = vmatprep.subr.bf16.mxu0 %v2177_v48  ;;  %v2258_v48 = vld [vmem:[#allocation8 + $0x20] sm:$0xff]  }
  0xff   : > { %1399 = vmatpush1.bf16.msra.mxu1 %v2237_v2 }
 0x100   : > { %1400 = vmatprep.subr.bf16.mxu1 %v2242_v5 }
 0x101   : > { %1107 = vmatpush1.bf16.msra.mxu0 %v2175_v51  ;;  %v2261_v51 = vld [vmem:[#allocation8 + $0x70] sm:$0xff]  }
 0x102   : > { %1108 = vmatprep.subr.bf16.mxu0 %v2183_v52  ;;  %v2262_v52 = vld [vmem:[#allocation8 + $0x30] sm:$0xff]  }
 0x103   : > { %1401 = vmatpush1.bf16.msra.mxu1 %v2240_v4 }
 0x104   : > { %1402 = vmatprep.subr.bf16.mxu1 %v2245_v6 }
 0x105   : > { %1109 = vmatpush1.bf16.msra.mxu0 %v2181_v55  ;;  %v1202_v55 = vld [vmem:[%s2799_s4] sm:$0x3] }
 0x106   : > { %1121 = vmatprep.subr.bf16.mxu0 %v2192_v56  ;;  %v1207_v56 = vrot.slane %v1202_v55, %v455_v17  ;;  %v1211_v57 = vrot.slane %v1202_v55, %v459_v19 }
 0x107   : > { %1403 = vmatpush1.bf16.msra.mxu1 %v2243_v7 }
 0x108   : > { %1111 = vmatmul.mubr.bf16.vlgmr.msra.gmra.mrb[0].mxu0 %v2185_v58  ;;  %1404 = vmatprep.subr.bf16.mxu1 %v2248_v8  ;;  %v1600_v8 = vand.u32 127, %v453_v15 }
 0x109   : > { %1122 = vmatpush1.bf16.msra.mxu0 %v2190_v60  ;;  %1153 = vmatprep.mubr.bf16.mxu0 %v2473_v63 }
 0x10a   : > { %vm1601_vm1 = vcmp.lt.s32.totalorder %v1600_v8, 10 }
 0x10b   : > { %1405 = vmatpush1.bf16.msra.mxu1 %v2246_v9 }
 0x10c   : > { %1917 = vmatprep.subr.bf16.mxu1 %v2249_v10 }
 0x114   : > { %1861 = vmatmul.mubr.msk.bf16.vlgmr.msra.gmra.mrb[0].mxu0 %vm988_vm0, %v2200_v3 }
 0x1a1   : > { %v1026_v11 = vpop.f32.mrb[0].mxu1 }
 0x1a2   : > { %v1028_v12 = vpop.f32.mrb[1].mxu1  ;;  %v1027_v22 = vadd.f32 %v1026_v11, %v456_v20  ;;  %v1894_v11 = vld [vmem:[%s2801_s6] ss:$0 sm:$0xff] }
 0x1a3   : > { %v1030_v13 = vpop.f32.mrb[2].mxu1  ;;  %v1029_v23 = vadd.f32 %v1028_v12, %v460_v21 }
 0x1a4   : > { %v1032_v14 = vpop.f32.mrb[3].mxu1  ;;  %v1031_v25 = vadd.f32 %v1030_v13, %v456_v20 }
 0x1a5   : > { %v1033_v28 = vadd.f32 %v1032_v14, %v460_v21 }
 0x1e7   : > { %v1155_v24 = vpop.f32.mrb[0].mxu0 }
 0x1e8   : > { %v1940_v26 = vadd.f32 %v1155_v24, %v1027_v22  ;;  %v1157_v27 = vpop.f32.mrb[1].mxu0 }
 0x1e9   : > { %v1942_v29 = vadd.f32 %v1157_v27, %v1029_v23  ;;  %v1159_v30 = vpop.f32.mrb[2].mxu0 }
 0x1ea   : > { %v1944_v31 = vadd.f32 %v1159_v30, %v1031_v25  ;;  %v1161_v32 = vpop.f32.mrb[3].mxu0  ;;  %v1164_v34 = vmax.f32 %v1940_v26, 0.0 }
 0x1eb   : > { %v1946_v33 = vadd.f32 %v1161_v32, %v1033_v28  ;;  %v1165_v36 = vmax.f32 %v1942_v29, 0.0 }
 0x1ec   : > { %v1166_v35 = vmax.f32 %v1944_v31, 0.0 }
 0x1ed   : > { %v1167_v37 = vmax.f32 %v1946_v33, 0.0 }
 0x1ee   : > { %v1168_v38 = vpack.c.bf16 %v1166_v35, %v1164_v34 }
 0x1ef   : > { %v1169_v39 = vpack.c.bf16 %v1167_v37, %v1165_v36 }
 0x1f1   : > { %1406 = vmatprep.mubr.bf16.mxu1 %v1169_v39 }
 0x1f2   : > { %1407 = vmatmul.mubr.bf16.vlgmr.msra.gmra.mrb[4].mxu1 %v1168_v38 }
 0x1f3   : > { %1918 = vmatpush3.bf16.msra.mxu1 %v2250_v40 }
 0x1f4   : > { %1919 = vmatprep.subr.bf16.mxu1 %v2251_v41 }
 0x1f7   : > { %1920 = vmatpush3.bf16.msra.mxu1 %v2252_v42 }
 0x1f8   : > { %1921 = vmatprep.subr.bf16.mxu1 %v2253_v43 }
 0x1fb   : > { %1922 = vmatpush3.bf16.msra.mxu1 %v2254_v44 }
 0x1fc   : > { %1923 = vmatprep.subr.bf16.mxu1 %v2255_v45 }
 0x1ff   : > { %1924 = vmatpush3.bf16.msra.mxu1 %v2256_v46 }
 0x200   : > { %1925 = vmatprep.subr.bf16.mxu1 %v2257_v47 }
 0x203   : > { %1926 = vmatpush3.bf16.msra.mxu1 %v2258_v48 }
 0x204   : > { %1927 = vmatprep.subr.bf16.mxu1 %v2259_v49 }
 0x207   : > { %1928 = vmatpush3.bf16.msra.mxu1 %v2260_v50 }
 0x208   : > { %1929 = vmatprep.subr.bf16.mxu1 %v2261_v51 }
 0x20b   : > { %1930 = vmatpush3.bf16.msra.mxu1 %v2262_v52 }
 0x20c   : > { %1931 = vmatprep.subr.bf16.mxu1 %v2263_v53 }
 0x20f   : > { %1932 = vmatpush3.bf16.msra.mxu1 %v2264_v54 }
 0x2c5   : > { %v1408_v58 = vpop.f32.mrb[4].mxu1 }
 0x2c6   : > { %v1409_v59 = vadd.f32 %v1408_v58, %v1207_v56  ;;  %v1410_v60 = vpop.f32.mrb[5].mxu1 }
 0x2c7   : > { %v1411_v61 = vadd.f32 %v1410_v60, %v1211_v57  ;;  %v1412_v62 = vpop.f32.mrb[6].mxu1 }
 0x2c8   : > { %v1413_v63 = vadd.f32 %v1412_v62, %v1207_v56  ;;  %v1414_v0 = vpop.f32.mrb[7].mxu1  ;;  %v1417_v2 = vmax.f32 %v1409_v59, 0.0 }
 0x2c9   : > { %v1415_v1 = vadd.f32 %v1414_v0, %v1211_v57  ;;  %v1418_v4 = vmax.f32 %v1411_v61, 0.0 }
 0x2ca   : > { %v1419_v3 = vmax.f32 %v1413_v63, 0.0 }
 0x2cb   : > { %v1420_v5 = vmax.f32 %v1415_v1, 0.0 }
 0x2cc   : > { %v1421_v6 = vpack.c.bf16 %v1419_v3, %v1417_v2 }
 0x2cd   : > { %v1422_v7 = vpack.c.bf16 %v1420_v5, %v1418_v4 }
 0x2cf   : > { %1590 = vmatprep.mubr.bf16.mxu1 %v1422_v7 }
 0x2d0   : > { %1591 = vmatmul.mubr.bf16.vlgmr.msra.gmra.mrb[8].mxu1 %v1421_v6 }
 0x3a3   : > { %v1933_v9 = vpop.f32.mrb[8].mxu1 }
 0x3a4   : > { %v1934_v10 = vpop.f32.mrb[9].mxu1 }
 0x3a5   : > { %v1935_v12 = vadd.f32 %v1934_v10, %v1933_v9  ;;  %v1936_v13 = vpop.f32.mrb[10].mxu1 }
 0x3a6   : > { %v1937_v14 = vpop.f32.mrb[11].mxu1 }
 0x3a7   : > { %v1938_v16 = vadd.f32 %v1937_v14, %v1936_v13  ;;  %v1593_v17 = vadd.f32 %v1935_v12, %v1894_v11 }
 0x3a9   : > { %v1602_v18 = vsel %vm1601_vm1, %v1593_v17, -inf  ;;  %v1596_v19 = vadd.f32 %v1938_v16, %v1894_v11 }
 0x3aa   : > { %1604 = vmax.xlane.f32.xlu0 %v1602_v18 }
 0x3ab   : > { %v1603_v20 = vsel %vm1601_vm1, %v1596_v19, -inf }
 0x3ae   : > { %1606 = vmax.xlane.f32.xlu0 %v1603_v20 }
 0x437   : > { %v1605_v21 = vpop.xlane.xlu0 %1604 }
 0x438   : > { %v1608_v15 = vsub.f32 %v1602_v18, %v1605_v21 }
 0x43a   : > { %v1610_v22 = vmul.f32 1.442695, %v1608_v15 }
 0x43b   : > { %v1607_v23 = vpop.xlane.xlu0 %1606 }
 0x43c   : > { %v1609_v24 = vsub.f32 %v1603_v20, %v1607_v23  ;;  %2265 = vpow2.f32 %v1610_v22 }
 0x43e   : > { %v1612_v25 = vmul.f32 1.442695, %v1609_v24 }
 0x440   : > { %2267 = vpow2.f32 %v1612_v25 }
 0x446   : > { %v2266_v26 = vpop.eup %2265 }
 0x447   : > { %1614 = vadd.xlane.f32.xlu1 %v2266_v26 }
 0x44a   : > { %v2268_v27 = vpop.eup %2267 }
 0x44b   : > { %1616 = vadd.xlane.f32.xlu1 %v2268_v27 }
 0x4d4   : > { %v1615_v28 = vpop.xlane.xlu1 %1614 }
 0x4d5   : > { %2269 = vlog2.f32 %v1615_v28 }
 0x4d8   : > { %v1617_v29 = vpop.xlane.xlu1 %1616 }
 0x4d9   : > { %2271 = vlog2.f32 %v1617_v29 }
 0x4df   : > { %v2270_v30 = vpop.eup %2269 }
 0x4e0   : > { %v1619_v31 = vmul.f32 0.6931472, %v2270_v30 }
 0x4e2   : > { %v1622_v32 = vsub.f32 %v1608_v15, %v1619_v31 }
 0x4e3   : > { %v2272_v33 = vpop.eup %2271 }
 0x4e4   : > { %1624 = vst [vmem:[%s341_s14] sm:$0xff] %v1622_v32  ;;  %v1621_v34 = vmul.f32 0.6931472, %v2272_v33 }
 0x4e6   : > { %v1623_v35 = vsub.f32 %v1609_v24, %v1621_v34 }
 0x4e8   : > { %1625 = vst [vmem:[%s341_s14 + $0x8] sm:$0xff] %v1623_v35 }
 0x4e9   : > { %2400 = shalt.err (!%p2397_p4)
}
 0x4ea   : > { %s2401_s11 = scalar_lea.hbm %s2752_s29, 256  ;;  %s2405_s16 = scalar_lea.hbm %s2802_s7, 1024 }
 0x4eb   : > { %p2402_p9 = scmp.ne.s32.totalorder %s2752_s29, %s2401_s11  ;;  %p2406_p8 = scmp.lt.u32.totalorder %s2752_s29, %s2802_s7 }
 0x4ec   : > { %p2407_p12 = scmp.lt.u32.totalorder %s2405_s16, %s2401_s11  ;;  %p2409_p0 = scmp.lt.u32.totalorder %s2401_s11, %s2752_s29 }
 0x4ed   : > { %p2403_p13 = pnand %p2402_p9, %p2661_p5 }
 0x4ee   : > { %p2408_p6 = por %p2407_p12, %p2406_p8 }
 0x4ef   : > { %p2404_p10 = pneg %p2403_p13 }
 0x4f0   : > { %p2410_p3 = por %p2409_p0, %p2408_p6 }
 0x4f2   : > { %p2411_p7 = pnand %p2410_p3, %p2404_p10 }
 0x4f4   : > { %2414 = shalt.err (!%p2411_p7)
}
 0x4f5   : > { %s2475_s18 = smov 128   ;;  %s2476_s23 = smov 8  }
 0x4f6   : > { %1972 = dma.vmem_to_hbm [thread:$0]  (%p2661_p5), %s2747_s17, 256, %s2752_s29, %s1627_s12, %s2475_s18, %s2475_s18, %s2476_s23  }
 0x4f7 PF: > { %s2822_s30 = sld [smem:[#allocation15_spill]]  ;;  %p1999_p11 = scmp.ge.s32.totalorder %s2461_s27, 2 }
 0x4f8   : > { %s1655_s28 = sand.u32 1, %s2449_s24  }
 0x4f9   : > { %s1656_s9 = scalar_lea.sflag [#allocation4], %s1655_s28 }
 0x4fd   : > { %p2823_p2 = scmp.ne.s32.totalorder %s2822_s30, 0 }
 0x4ff   : > { %p1989_p1 = pnand %p1999_p11, %p2823_p2 }
 0x501   : > { %2444 = dma.done.wait (!%p1989_p1), %s1656_s9, 256  }
 0x502   : > { %2446 = vsyncadd (!%p1989_p1), %s1656_s9, 4294967040  ;;  %p22_p4 = scmp.ge.s32.totalorder %s2647_s8, 6   ;;  %s2824_s24 = smov %s2453_s25 }
 0x503   : > { %s2825_s25 = smov %s2457_s26  ;;  %s2826_s26 = smov %s2657_s19 }
 0x504   : > { %s2827_s27 = smov %s2647_s8  ;;  %24 = sbr.rel (!%p22_p4) target bundleno = 7 (0x7), region = 105 }
 0x50b   :  { %1661 = vsyncpa [#allocation3], 1 }
 0x50c   :  { %1663 = vsyncpa [#allocation3 + $0x1], 1 }
 0x50d   :  { %1664 = vsyncpa [#allocation6], 1 }
 0x50e   :  { %1665 = vsyncpa [#allocation9], 1 }
 0x50f   :  { %1666 = vsyncpa [#allocation4], 1 }
 0x510   :  { %1668 = vsyncpa [#allocation4 + $0x1], 1 }

</bundles_post_ra>
